<compile_context>
chip_gen: v7x
topology: tpu7x:2x2x1
jax: 0.10.0
libtpu: 0.0.40
codegen_flags: <defaults>
</compile_context>

<pallas_src>
import functools

import jax
import jax.numpy as jnp
from jax.experimental import pallas as pl
from jax.experimental.pallas import tpu as pltpu

_LANES = 128
_MAX_BLOCK_ROWS = 2048          # 2048*128 f32 = 1 MiB per operand buffer
_TARGET_GRID = 8                # aim for ~8 grid steps (>=2 for v7x megacore)
_PALLAS_MIN_N = 2048            # below this, plain-JAX/XLA fusion is faster
_VMEM_LIMIT_BYTES = 32 * 1024 * 1024


# --------------------------------------------------------------------------
# kernel
# --------------------------------------------------------------------------
def _iou_loss_kernel(p_start_ref, p_end_ref, t_start_ref, t_end_ref, *rest,
                     eps, loss_weight, with_weight, emit_loss):
    """1-D segment IoU loss on lane-dense (block_rows, 128) slabs.

    Outputs:
      emit_loss=True : per-element (weighted, loss_weight-scaled) loss slab,
                       shape (block_rows, 128), in out_ref.dtype.
      emit_loss=False: per-tile partial sums, shape (8, 128), f32.
    """
    if with_weight:
        w_ref, out_ref = rest
    else:
        (out_ref,) = rest

    ps = p_start_ref[...].astype(jnp.float32)
    pe = p_end_ref[...].astype(jnp.float32)
    ts = t_start_ref[...].astype(jnp.float32)
    te = t_end_ref[...].astype(jnp.float32)

    # segment_overlaps(pred, target, is_aligned=True)
    lt = jnp.maximum(ps, ts)
    rb = jnp.minimum(pe, te)
    overlap = jnp.maximum(rb - lt, 0.0)
    union = jnp.maximum((pe - ps) + (te - ts) - overlap, eps)
    ious = jnp.maximum(overlap / union, eps)        # .clamp(min=eps)
    loss = -jnp.log(ious)

    if with_weight:
        loss = loss * w_ref[...].astype(jnp.float32)
    if loss_weight != 1.0:                          # compile-time constant
        loss = loss * jnp.float32(loss_weight)

    if emit_loss:
        out_ref[...] = loss.astype(out_ref.dtype)
    else:
        # sublane-group reduce via free reshape + VPU adds; (8,128)-clean store
        br = loss.shape[0]
        out_ref[...] = jnp.sum(loss.reshape(br // 8, 8, _LANES), axis=0)


# --------------------------------------------------------------------------
# wrapper helpers
# --------------------------------------------------------------------------
def _round_up(x, m):
    return (x + m - 1) // m * m


def _sublane_align(dtype):
    # f32 -> 8, bf16/f16 -> 16, 8-bit -> 32
    return max(8, 32 // jnp.dtype(dtype).itemsize)


def _to_lane_slab(x, rows_total, pad_value):
    """(n,) -> (rows_total, 128) lane-dense slab, tail padded to pad_value."""
    n = x.shape[0]
    n_pad = rows_total * _LANES
    if n_pad != n:
        x = jnp.pad(x, (0, n_pad - n), constant_values=pad_value)
    return x.reshape(rows_total, _LANES)


def _choose_tiling(n, sub, max_block_rows):
    """Pick (block_rows, grid_n, rows_total) with small pad and grid_n ~ 8."""
    rows_needed = max(1, pl.cdiv(n, _LANES))
    rows_a = _round_up(rows_needed, sub)
    grid_target = max(1, min(_TARGET_GRID, rows_a // sub))
    block_rows = min(_round_up(max_block_rows, sub),
                     _round_up(pl.cdiv(rows_a, grid_target), sub))
    grid_n = pl.cdiv(rows_a, block_rows)
    rows_total = grid_n * block_rows
    return block_rows, grid_n, rows_total


def _iou_loss_pallas(p_start, p_end, t_start, t_end, weight, *, eps,
                     loss_weight, emit_loss, max_block_rows=_MAX_BLOCK_ROWS):
    n = p_start.shape[0]
    in_dtype = p_start.dtype
    sub = _sublane_align(in_dtype)
    if weight is not None:
        sub = max(sub, _sublane_align(weight.dtype))

    block_rows, grid_n, rows_total = _choose_tiling(n, sub, max_block_rows)

    # padded tail segments are identical (iou == 1 -> loss == 0): no masking
    ins = [
        _to_lane_slab(p_start, rows_total, 0.0),
        _to_lane_slab(p_end, rows_total, 1.0),
        _to_lane_slab(t_start, rows_total, 0.0),
        _to_lane_slab(t_end, rows_total, 1.0),
    ]
    with_weight = weight is not None
    if with_weight:
        ins.append(_to_lane_slab(weight, rows_total, 0.0))

    in_spec = pl.BlockSpec((block_rows, _LANES), lambda i: (i, 0))
    in_specs = [in_spec] * len(ins)

    if emit_loss:
        out_shape = jax.ShapeDtypeStruct((rows_total, _LANES), in_dtype)
        out_spec = pl.BlockSpec((block_rows, _LANES), lambda i: (i, 0))
    else:
        out_shape = jax.ShapeDtypeStruct((grid_n * 8, _LANES), jnp.float32)
        out_spec = pl.BlockSpec((8, _LANES), lambda i: (i, 0))

    kernel = functools.partial(_iou_loss_kernel, eps=eps,
                               loss_weight=loss_weight,
                               with_weight=with_weight, emit_loss=emit_loss)

    out = pl.pallas_call(
        kernel,
        out_shape=out_shape,
        grid=(grid_n,),
        in_specs=in_specs,
        out_specs=out_spec,
        compiler_params=pltpu.CompilerParams(
            dimension_semantics=("parallel",),       # independent tiles
            allow_input_fusion=[True] * len(ins),    # fuse slice/pad/reshape
            vmem_limit_bytes=_VMEM_LIMIT_BYTES),
    )(*ins)

    if emit_loss:
        # TODO(synk): fuse this de-pad slice with the consumer when possible.
        return out.reshape(-1)[:n]                   # (n,) per-elem loss
    return jnp.sum(out)                              # scalar (weighted) sum


def _iou_loss_jax(p_start, p_end, t_start, t_end, eps):
    """Plain-JAX elementwise loss (fallback for small n, and reference)."""
    ps = p_start.astype(jnp.float32)
    pe = p_end.astype(jnp.float32)
    ts = t_start.astype(jnp.float32)
    te = t_end.astype(jnp.float32)
    lt = jnp.maximum(ps, ts)
    rb = jnp.minimum(pe, te)
    overlap = jnp.maximum(rb - lt, 0.0)
    union = jnp.maximum((pe - ps) + (te - ts) - overlap, eps)
    ious = jnp.maximum(overlap / union, eps)
    return -jnp.log(ious)


# --------------------------------------------------------------------------
# IoULoss.forward equivalent
# --------------------------------------------------------------------------
def iou_loss_forward(pred, target, weight=None, avg_factor=None,
                     reduction_override=None, *, eps=1e-6, reduction='mean',
                     loss_weight=1.0, use_pallas=None,
                     max_block_rows=_MAX_BLOCK_ROWS):
    """JAX/Pallas equivalent of IoULoss.forward."""
    assert reduction_override in (None, 'none', 'mean', 'sum')
    red = reduction_override if reduction_override else reduction
    assert red in ('none', 'mean', 'sum')

    n = pred.shape[0]

    # NOTE: the PyTorch module short-circuits on an all-zero weight via
    # `torch.any(weight > 0)`. That would require a host sync / break jit;
    # the normal weighted path already yields 0 in that case, so the shortcut
    # is dropped (forward value is identical).

    if weight is not None and weight.ndim > 1:
        assert weight.shape == pred.shape
        weight = weight.mean(-1)

    if use_pallas is None:
        use_pallas = n >= _PALLAS_MIN_N

    p_start, p_end = pred[:, 0], pred[:, 1]
    t_start, t_end = target[:, 0], target[:, 1]

    if red == 'none':
        if use_pallas:
            # loss_weight + weight are fused into the kernel
            return _iou_loss_pallas(p_start, p_end, t_start, t_end, weight,
                                    eps=eps, loss_weight=loss_weight,
                                    emit_loss=True,
                                    max_block_rows=max_block_rows)
        loss = _iou_loss_jax(p_start, p_end, t_start, t_end, eps)
        if weight is not None:
            loss = loss * weight.astype(loss.dtype)
        # avg_factor is ignored for reduction='none' (matches mmdet)
        return loss_weight * loss

    # 'mean' / 'sum': sum-only path (skips writing per-element loss to HBM)
    if use_pallas:
        total = _iou_loss_pallas(p_start, p_end, t_start, t_end, weight,
                                 eps=eps, loss_weight=loss_weight,
                                 emit_loss=False,
                                 max_block_rows=max_block_rows)
    else:
        loss = _iou_loss_jax(p_start, p_end, t_start, t_end, eps)
        if weight is not None:
            loss = loss * weight.astype(loss.dtype)
        total = loss_weight * jnp.sum(loss)

    if red == 'sum':
        if avg_factor is not None:
            raise ValueError('avg_factor can not be used with reduction="sum"')
        return total
    # 'mean'
    denom = jnp.float32(n) if avg_factor is None else jnp.float32(avg_factor)
    return total / denom


# --------------------------------------------------------------------------
# self-test
# --------------------------------------------------------------------------
if __name__ == "__main__":
    key = jax.random.PRNGKey(0)

    def make_case(key, n):
        k1, k2, k3, k4, k5 = jax.random.split(key, 5)
        p_start = jax.random.uniform(k1, (n,), jnp.float32)
        p_len = jax.random.uniform(k2, (n,), jnp.float32, minval=0.1, maxval=1.0)
        t_start = jax.random.uniform(k3, (n,), jnp.float32)
        t_len = jax.random.uniform(k4, (n,), jnp.float32, minval=0.1, maxval=1.0)
        w = jax.random.uniform(k5, (n,), jnp.float32)
        pred = jnp.stack([p_start, p_start + p_len], axis=-1)     # (n, 2)
        target = jnp.stack([t_start, t_start + t_len], axis=-1)   # (n, 2)
        return pred, target, w

    # ---- small case (single grid step) -----------------------------------
    k_a, k_b = jax.random.split(key)
    pred, target, w = make_case(k_a, 300)
    loss_ref = _iou_loss_jax(pred[:, 0], pred[:, 1],
                             target[:, 0], target[:, 1], 1e-6)

    out_mean = iou_loss_forward(pred, target, use_pallas=True)
    out_none = iou_loss_forward(pred, target, reduction_override='none',
                                use_pallas=True)
    out_sum_w = iou_loss_forward(pred, target, weight=w,
                                 reduction_override='sum', use_pallas=True)
    out_mean_lw = iou_loss_forward(pred, target, use_pallas=True,
                                   loss_weight=2.0)
    jax.block_until_ready((out_mean, out_none, out_sum_w, out_mean_lw))

    assert jnp.allclose(out_mean, jnp.mean(loss_ref), rtol=1e-5, atol=1e-5)
    assert jnp.allclose(out_none, loss_ref, rtol=1e-5, atol=1e-5)
    assert jnp.allclose(out_sum_w, jnp.sum(loss_ref * w), rtol=1e-4, atol=1e-4)
    assert jnp.allclose(out_mean_lw, 2.0 * jnp.mean(loss_ref),
                        rtol=1e-5, atol=1e-5)

    # ---- multi-tile case (grid_n > 1, exercises (8,128) sum blocks) -------
    pred2, target2, w2 = make_case(k_b, 2500)
    loss_ref2 = _iou_loss_jax(pred2[:, 0], pred2[:, 1],
                              target2[:, 0], target2[:, 1], 1e-6)

    out_mean2 = iou_loss_forward(pred2, target2, use_pallas=True)
    out_none2 = iou_loss_forward(pred2, target2, reduction_override='none',
                                 use_pallas=True)
    out_sum_w2 = iou_loss_forward(pred2, target2, weight=w2,
                                  reduction_override='sum', use_pallas=True)
    jax.block_until_ready((out_mean2, out_none2, out_sum_w2))

    assert jnp.allclose(out_mean2, jnp.mean(loss_ref2), rtol=1e-5, atol=1e-5)
    assert jnp.allclose(out_none2, loss_ref2, rtol=1e-5, atol=1e-5)
    assert jnp.allclose(out_sum_w2, jnp.sum(loss_ref2 * w2),
                        rtol=1e-4, atol=1e-4)

    # ---- bf16 inputs (native-dtype path, 16-row-aligned blocks) -----------
    out_bf16 = iou_loss_forward(pred2.astype(jnp.bfloat16),
                                target2.astype(jnp.bfloat16),
                                reduction_override='none', use_pallas=True)
    jax.block_until_ready(out_bf16)
    assert out_bf16.shape == (2500,)
    assert bool(jnp.all(jnp.isfinite(out_bf16.astype(jnp.float32))))

    # ---- small-n plain-JAX fallback (auto dispatch) ------------------------
    out_fallback = iou_loss_forward(pred, target)
    jax.block_until_ready(out_fallback)
    assert jnp.allclose(out_fallback, jnp.mean(loss_ref), rtol=1e-5, atol=1e-5)

    print("KERNEL_OK")
</pallas_src>

<mosaic_0001>
module attributes {stable_mosaic.version = 11 : i64} {
  func.func @_iou_loss_kernel(%arg0: i32, %arg1: memref<8x128xf32, #tpu.memory_space<vmem>>, %arg2: memref<8x128xf32, #tpu.memory_space<vmem>>, %arg3: memref<8x128xf32, #tpu.memory_space<vmem>>, %arg4: memref<8x128xf32, #tpu.memory_space<vmem>>, %arg5: memref<8x128xf32, #tpu.memory_space<vmem>>) attributes {dimension_semantics = [#tpu.dimension_semantics<parallel>], iteration_bounds = array<i64: 1>, scalar_prefetch = 0 : i64, scratch_operands = 0 : i64, tpu.core_type = #tpu.core_type<tc>, window_params = [{transform_indices = @transform_0, window_bounds = array<i64: 8, 128>}, {transform_indices = @transform_1, window_bounds = array<i64: 8, 128>}, {transform_indices = @transform_2, window_bounds = array<i64: 8, 128>}, {transform_indices = @transform_3, window_bounds = array<i64: 8, 128>}, {transform_indices = @transform_4, window_bounds = array<i64: 8, 128>}]} {
    %c0 = arith.constant 0 : index
    %c0_0 = arith.constant 0 : index
    %0 = vector.load %arg1[%c0, %c0_0] : memref<8x128xf32, #tpu.memory_space<vmem>>, vector<8x128xf32>
    %c0_1 = arith.constant 0 : index
    %c0_2 = arith.constant 0 : index
    %1 = vector.load %arg2[%c0_1, %c0_2] : memref<8x128xf32, #tpu.memory_space<vmem>>, vector<8x128xf32>
    %c0_3 = arith.constant 0 : index
    %c0_4 = arith.constant 0 : index
    %2 = vector.load %arg3[%c0_3, %c0_4] : memref<8x128xf32, #tpu.memory_space<vmem>>, vector<8x128xf32>
    %c0_5 = arith.constant 0 : index
    %c0_6 = arith.constant 0 : index
    %3 = vector.load %arg4[%c0_5, %c0_6] : memref<8x128xf32, #tpu.memory_space<vmem>>, vector<8x128xf32>
    %4 = arith.maximumf %0, %2 : vector<8x128xf32>
    %5 = arith.minimumf %1, %3 : vector<8x128xf32>
    %6 = arith.subf %5, %4 : vector<8x128xf32>
    %cst = arith.constant 0.000000e+00 : f32
    %7 = vector.broadcast %cst : f32 to vector<8x128xf32>
    %8 = arith.maximumf %6, %7 : vector<8x128xf32>
    %9 = arith.subf %1, %0 : vector<8x128xf32>
    %10 = arith.subf %3, %2 : vector<8x128xf32>
    %11 = arith.addf %9, %10 : vector<8x128xf32>
    %12 = arith.subf %11, %8 : vector<8x128xf32>
    %cst_7 = arith.constant 9.99999997E-7 : f32
    %13 = vector.broadcast %cst_7 : f32 to vector<8x128xf32>
    %14 = arith.maximumf %12, %13 : vector<8x128xf32>
    %15 = arith.divf %8, %14 : vector<8x128xf32>
    %cst_8 = arith.constant 9.99999997E-7 : f32
    %16 = vector.broadcast %cst_8 : f32 to vector<8x128xf32>
    %17 = arith.maximumf %15, %16 : vector<8x128xf32>
    %18 = math.log %17 : vector<8x128xf32>
    %cst_9 = arith.constant 0.000000e+00 : f32
    %19 = vector.broadcast %cst_9 : f32 to vector<8x128xf32>
    %20 = arith.subf %19, %18 : vector<8x128xf32>
    %21 = vector.shape_cast %20 : vector<8x128xf32> to vector<1x8x128xf32>
    %cst_10 = arith.constant dense<0.000000e+00> : vector<8x128xf32>
    %22 = vector.multi_reduction <add>, %21, %cst_10 [0] : vector<1x8x128xf32> to vector<8x128xf32>
    %c0_11 = arith.constant 0 : index
    %c0_12 = arith.constant 0 : index
    %23 = vector.load %arg5[%c0_11, %c0_12] : memref<8x128xf32, #tpu.memory_space<vmem>>, vector<8x128xf32>
    tpu.vector_store %arg5[%c0_11, %c0_12], %22 {strides = array<i32>} : memref<8x128xf32, #tpu.memory_space<vmem>>, vector<8x128xf32>,
    return
  }
  func.func @transform_0(%arg0: i32) -> (i32, i32) {
    %c0_i32 = arith.constant 0 : i32
    %c0_i32_0 = arith.constant 0 : i32
    return %arg0, %c0_i32 : i32, i32
  }
  func.func @transform_1(%arg0: i32) -> (i32, i32) {
    %c0_i32 = arith.constant 0 : i32
    %c0_i32_0 = arith.constant 0 : i32
    return %arg0, %c0_i32 : i32, i32
  }
  func.func @transform_2(%arg0: i32) -> (i32, i32) {
    %c0_i32 = arith.constant 0 : i32
    %c0_i32_0 = arith.constant 0 : i32
    return %arg0, %c0_i32 : i32, i32
  }
  func.func @transform_3(%arg0: i32) -> (i32, i32) {
    %c0_i32 = arith.constant 0 : i32
    %c0_i32_0 = arith.constant 0 : i32
    return %arg0, %c0_i32 : i32, i32
  }
  func.func @transform_4(%arg0: i32) -> (i32, i32) {
    %c0_i32 = arith.constant 0 : i32
    %c0_i32_0 = arith.constant 0 : i32
    return %arg0, %c0_i32 : i32, i32
  }
}

</mosaic_0001>

<bundles_post_ra>
// kernel: tpu_custom_call.1
= control target key start
LH: loop header
LB: loop body
LE: loop exit
PB: predicated region body
PF: predicated region fallthrough
CT: control target
= control target key end

     0   :  { %9 = vsyncpa [#allocation3], 0  ;;  %s272_s0 = inlined_call_operand.hbm [shape: f32[8,128], index: 0, kind: input, shape index: {}]   ;;  %s273_s1 = inlined_call_operand.hbm [shape: f32[8,128], index: 1, kind: input, shape index: {}]   ;;  %s274_s2 = inlined_call_operand.hbm [shape: f32[8,128], index: 2, kind: input, shape index: {}]   ;;  %s275_s3 = inlined_call_operand.vmem [shape: f32[8,128], index: 3, kind: input, shape index: {}]   ;;  %s276_s4 = inlined_call_operand.hbm [shape: f32[8,128], index: 4, kind: output, shape index: {}]  }
   0x1   :  { %10 = vsyncpa [#allocation6], 0 }
   0x2   :  { %11 = vsyncpa [#allocation4], 0  ;;  %s192_s15 = smov [#allocation5]   ;;  %s193_s17 = smov [#allocation2]  }
   0x3   :  { %s28_s16 = sshll.u32 %s192_s15, 4  ;;  %s18_s18 = sshll.u32 %s193_s17, 4  ;;  %s29_s16 = int_to_ptr.vmem [resolvable:$true] %s28_s16  ;;  %s19_s18 = int_to_ptr.vmem [resolvable:$true] %s18_s18 }
   0x4   :  { %s98_s21 = scalar_lea.hbm %s273_s1, 128 }
   0x5   :  { %p99_p0 = scmp.ne.s32.totalorder %s273_s1, %s98_s21  ;;  %p102_p1 = scmp.lt.u32.totalorder %s98_s21, %s273_s1 }
   0x7   :  { %p104_p2 = pnand %p102_p1, %p99_p0 }
   0x9   :  { %107 = shalt.err (!%p104_p2)
}
   0xa   :  { %s108_s26 = scalar_lea.vmem %s29_s16, 128  ;;  %p113_p4 = scmp.lt.s32.totalorder %s29_s16, %s29_s16 }
   0xb   :  { %p109_p3 = scmp.ne.s32.totalorder %s29_s16, %s108_s26  ;;  %p114_p5 = scmp.lt.s32.totalorder %s108_s26, %s108_s26 }
   0xd   :  { %p115_p6 = por %p114_p5, %p113_p4 }
   0xf   :  { %p116_p7 = pnand %p115_p6, %p109_p3 }
  0x11   :  { %119 = shalt.err (!%p116_p7)
}
  0x12   :  { %31 = dma.hbm_to_vmem [thread:$0]  %s273_s1, 128, %s29_s16, [#allocation6]  }
  0x13   :  { %s120_s5 = scalar_lea.hbm %s272_s0, 128 }
  0x14   :  { %p121_p8 = scmp.ne.s32.totalorder %s272_s0, %s120_s5  ;;  %p124_p9 = scmp.lt.u32.totalorder %s120_s5, %s272_s0 }
  0x16   :  { %p126_p10 = pnand %p124_p9, %p121_p8 }
  0x18   :  { %129 = shalt.err (!%p126_p10)
}
  0x19   :  { %s130_s10 = scalar_lea.vmem %s19_s18, 128  ;;  %p135_p12 = scmp.lt.s32.totalorder %s19_s18, %s19_s18 }
  0x1a   :  { %p131_p11 = scmp.ne.s32.totalorder %s19_s18, %s130_s10  ;;  %p136_p13 = scmp.lt.s32.totalorder %s130_s10, %s130_s10 }
  0x1c   :  { %p137_p0 = por %p136_p13, %p135_p12 }
  0x1e   :  { %p138_p1 = pnand %p137_p0, %p131_p11 }
  0x20   :  { %141 = shalt.err (!%p138_p1)
}
  0x21   :  { %21 = dma.hbm_to_vmem [thread:$0]  %s272_s0, 128, %s19_s18, [#allocation3]  }
  0x22   :  { %s194_s12 = smov [#allocation7]   ;;  %s142_s16 = scalar_lea.hbm %s274_s2, 128 }
  0x23   :  { %s38_s13 = sshll.u32 %s194_s12, 4  ;;  %p143_p2 = scmp.ne.s32.totalorder %s274_s2, %s142_s16  ;;  %s39_s13 = int_to_ptr.vmem [resolvable:$true] %s38_s13 }
  0x24   :  { %p146_p3 = scmp.lt.u32.totalorder %s142_s16, %s274_s2 }
  0x26   :  { %p148_p4 = pnand %p146_p3, %p143_p2 }
  0x28   :  { %151 = shalt.err (!%p148_p4)
}
  0x29   :  { %s152_s22 = scalar_lea.vmem %s39_s13, 128  ;;  %p157_p6 = scmp.lt.s32.totalorder %s39_s13, %s39_s13 }
  0x2a   :  { %p153_p5 = scmp.ne.s32.totalorder %s39_s13, %s152_s22  ;;  %p158_p7 = scmp.lt.s32.totalorder %s152_s22, %s152_s22 }
  0x2c   :  { %p159_p8 = por %p158_p7, %p157_p6 }
  0x2e   :  { %p160_p9 = pnand %p159_p8, %p153_p5 }
  0x30   :  { %163 = shalt.err (!%p160_p9)
}
  0x31   :  { %41 = dma.hbm_to_vmem [thread:$0]  %s274_s2, 128, %s39_s13, [#allocation6]  }
  0x32   :  { %186 = dma.done.wait [#allocation3], 128  }
  0x33   :  { %187 = vsyncadd [#allocation3], 4294967168 }
  0x34   :  { %188 = dma.done.wait [#allocation6], 256  }
  0x35   :  { %189 = vsyncadd [#allocation6], 4294967040  ;;  %v53_v0 = vld [vmem:[#allocation2] sm:$0xff]  ;;  %v54_v1 = vld [vmem:[#allocation5] sm:$0xff]  ;;  %s195_s2 = smov [#allocation8]  }
  0x36   :  { %v55_v2 = vld [vmem:[#allocation7] sm:$0xff]  ;;  %v56_v3 = vld [vmem:[%s275_s3] sm:$0xff]  ;;  %v61_v5 = vsub.f32 %v54_v1, %v53_v0  ;;  %s80_s25 = sshll.u32 %s195_s2, 4  ;;  %s81_s25 = int_to_ptr.vmem [resolvable:$true] %s80_s25 }
  0x37   :  { %v57_v4 = vmax.f32 %v53_v0, %v55_v2  ;;  %v58_v6 = vmin.f32 %v54_v1, %v56_v3  ;;  %v62_v7 = vsub.f32 %v56_v3, %v55_v2  ;;  %s164_s3 = scalar_lea.vmem %s81_s25, 128  ;;  %p169_p11 = scmp.lt.s32.totalorder %s81_s25, %s81_s25 }
  0x38   :  { %p165_p10 = scmp.ne.s32.totalorder %s81_s25, %s164_s3  ;;  %p170_p12 = scmp.lt.s32.totalorder %s164_s3, %s164_s3 }
  0x39   :  { %v59_v8 = vsub.f32 %v58_v6, %v57_v4  ;;  %v63_v9 = vadd.f32 %v62_v7, %v61_v5 }
  0x3a   :  { %p171_p13 = por %p170_p12, %p169_p11 }
  0x3b   :  { %v60_v10 = vmax.f32 %v59_v8, 0.0 }
  0x3c   :  { %p172_p0 = pnand %p171_p13, %p165_p10 }
  0x3d   :  { %v64_v11 = vsub.f32 %v63_v9, %v60_v10 }
  0x3f   :  { %v65_v12 = vmax.f32 %v64_v11, 1e-06 }
  0x41   :  { %94 = vrcp.f32 %v65_v12 }
  0x4b   :  { %v95_v13 = vpop.eup %94 }
  0x4c   :  { %v67_v14 = vmul.f32 %v95_v13, %v60_v10 }
  0x4e   :  { %v68_v15 = vmax.f32 %v67_v14, 1e-06 }
  0x50   :  { %96 = vlog2.f32 %v68_v15 }
  0x5a   :  { %v97_v16 = vpop.eup %96 }
  0x5b   :  { %v70_v17 = vmul.f32 0.6931472, %v97_v16 }
  0x5d   :  { %v71_v18 = vsub.f32 0.0, %v70_v17 }
  0x5f   :  { %73 = vst [vmem:[#allocation8] sm:$0xff] %v71_v18 }
  0x60   :  { %175 = shalt.err (!%p172_p0)
}
  0x61   :  { %s176_s28 = scalar_lea.hbm %s276_s4, 128 }
  0x62   :  { %p177_p1 = scmp.ne.s32.totalorder %s276_s4, %s176_s28  ;;  %p180_p2 = scmp.lt.u32.totalorder %s176_s28, %s276_s4 }
  0x64   :  { %p182_p3 = pnand %p180_p2, %p177_p1 }
  0x66   :  { %185 = shalt.err (!%p182_p3)
}
  0x67   :  { %83 = dma.vmem_to_hbm [thread:$0]  %s81_s25, 128, %s276_s4, [#allocation4]  }
  0x68   :  { %190 = dma.done.wait [#allocation4], 128  }
  0x69   :  { %191 = vsyncadd [#allocation4], 4294967168 }
  0x6a   :  { %87 = vsyncpa [#allocation3], 1 }
  0x6b   :  { %88 = vsyncpa [#allocation6], 1 }
  0x6c   :  { %89 = vsyncpa [#allocation4], 1 }

</bundles_post_ra>
